<compile_context>
chip_gen: v5e
topology: v5e:2x2
jax: 0.10.0
libtpu: 0.0.40
codegen_flags: <defaults>
</compile_context>

<pallas_src>
import functools

import jax
import jax.numpy as jnp
from jax.experimental import pallas as pl
from jax.experimental.pallas import tpu as pltpu


def _round_up(x: int, m: int) -> int:
    return ((x + m - 1) // m) * m


def _cdiv(a: int, b: int) -> int:
    return -(-a // b)


def _vmem_capacity_bytes() -> int:
    """Per-core VMEM capacity; conservative 64 MiB (v7x) if the query fails."""
    try:
        return int(pltpu.get_tpu_info().vmem_capacity_bytes)
    except Exception:
        return 64 << 20


# ---------------------------------------------------------------------------
# Kernels
# ---------------------------------------------------------------------------
def _residual_linear_kernel_full(x_ref, w_ref, b_ref, o_ref, *, cast_bf16):
    """Whole feature dim in one tile: o = x + relu(x @ W + b)."""
    x = x_ref[...]                                                   # (tm, D)
    x_mm = x.astype(jnp.bfloat16) if cast_bf16 else x
    h = jnp.dot(x_mm, w_ref[...], preferred_element_type=jnp.float32)
    h = jnp.maximum(h + b_ref[...].astype(jnp.float32), 0.0)
    o_ref[...] = (x.astype(jnp.float32) + h).astype(o_ref.dtype)


def _residual_linear_kernel_cols(x_ref, w_ref, b_ref, o_ref, *, tn, cast_bf16):
    """Output columns tiled: x (tm, D) and bias (1, D) are VMEM-resident
    across the column grid axis; the weight is streamed as [D, tn] stripes
    (tn % 128 == 0); bias / residual stripes are sliced in-kernel."""
    j = pl.program_id(1)
    x = x_ref[...]                                                   # (tm, D)
    x_mm = x.astype(jnp.bfloat16) if cast_bf16 else x
    h = jnp.dot(x_mm, w_ref[...], preferred_element_type=jnp.float32)  # (tm, tn)
    col = pl.multiple_of(j * tn, 128)
    b_stripe = b_ref[:, pl.ds(col, tn)].astype(jnp.float32)         # (1, tn)
    h = jnp.maximum(h + b_stripe, 0.0)
    x_cols = x_ref[:, pl.ds(col, tn)].astype(jnp.float32)           # (tm, tn)
    o_ref[...] = (x_cols + h).astype(o_ref.dtype)


# ---------------------------------------------------------------------------
# Wrapper
# ---------------------------------------------------------------------------
def residual_linear(x, w, b, *, tm=None, tn=None, donate_x=False, mxu_bf16=False):
    """y = x + relu(x @ w + b).

    x: [..., D] (leading dims flattened internally), w: [D, D] stored
    pre-transposed (kernel computes x @ w == x @ W_torch.T), b: [D].
    mxu_bf16: opt-in -- cast f32 x/W to bf16 for the MXU (f32 accumulation
    and f32 epilogue kept); accuracy tradeoff for large-D compute-bound cases.
    """
    orig_shape = x.shape
    D = orig_shape[-1]
    assert w.shape == (D, D), "weight must be [D, D], pre-transposed (x @ w)"
    assert b.shape == (D,)

    x2 = x.reshape(-1, D)
    M = x2.shape[0]
    b2 = b.reshape(1, D)

    # Optional bf16 MXU path for f32 inputs: cast W once in the wrapper
    # (halves W HBM traffic + VMEM), cast x per-tile inside the kernel.
    w_pass = w
    if mxu_bf16 and w.dtype == jnp.float32:
        w_pass = w.astype(jnp.bfloat16)
    cast_bf16 = (x.dtype == jnp.float32) and (w_pass.dtype == jnp.bfloat16)

    x_bytes = jnp.dtype(x.dtype).itemsize
    w_bytes = jnp.dtype(w_pass.dtype).itemsize
    b_bytes = jnp.dtype(b.dtype).itemsize
    sublane = 16 if x_bytes == 2 else 8          # bf16 packs 16 rows / vreg

    has_buffered = hasattr(pl, "Buffered")
    w_bufs_full = 1 if has_buffered else 2

    vmem_cap = _vmem_capacity_bytes()
    budget = int(0.75 * vmem_cap)                # leave headroom for compiler
    scratch = 2 << 20

    # ---- column tile: full weight resident if it fits the per-gen budget ---
    if tn is None:
        full_need_min = (w_bufs_full * D * D * w_bytes
                         + 4 * 256 * D * x_bytes + scratch)
        if D % 128 != 0 or full_need_min <= budget:
            # TODO(synk): if D % 128 != 0 AND the full weight exceeds VMEM,
            # there is no streaming fallback here (no 128-multiple stripe);
            # such shapes are not expected for a d_int x d_int Linear.
            tn = D
        else:
            tn = 512
            while tn > 128 and D % tn != 0:
                tn -= 128
    if tn != D:
        assert D % tn == 0 and tn % 128 == 0, "tn must be a 128-multiple divisor of D"
    wcol_bufs = 3 if (tn <= 256 and has_buffered) else 2

    # ---- row tile: largest of {1024,512,256,128} fitting the VMEM budget ---
    if tm is None:
        tm = 128
        for cand in (1024, 512, 256, 128):
            if tn == D:
                cost = w_bufs_full * D * D * w_bytes + 4 * cand * D * x_bytes
            else:
                cost = (wcol_bufs * D * tn * w_bytes
                        + 2 * cand * D * x_bytes + 2 * cand * tn * x_bytes)
            if cost + scratch <= budget:
                tm = cand
                break
    # Alignment / clamping: 128-aligned row tiles for large M (MXU height,
    # unmasked stores), sublane-aligned single tile for tiny M.
    if M >= 128:
        tm = _round_up(min(tm, _round_up(M, 128)), 128)
    else:
        tm = max(sublane, _round_up(min(tm, _round_up(M, sublane)), sublane))

    # v7x megacore: make sure the "parallel" row axis has enough steps to
    # feed both TensorCores (harmless on v5e/v6e: per-step overhead ~0.35us).
    if _cdiv(M, tm) < 4 and M >= 4 * 128:
        tm = _round_up(_cdiv(M, 4), 128)

    # ---- VMEM limit derived from the actual buffers, capped to hardware ----
    if tn == D:
        need = (w_bufs_full * (D * D * w_bytes + max(D, 128) * b_bytes)
                + 4 * tm * D * x_bytes + scratch)
    else:
        need = (wcol_bufs * D * tn * w_bytes + max(D, 128) * b_bytes
                + 2 * tm * D * x_bytes + 2 * tm * tn * x_bytes + scratch)
    vmem_limit = min(max(32 << 20, int(1.25 * need)), int(0.9 * vmem_cap))

    # ---- grid / specs (no padding: rely on partial last-block handling) ----
    n_row_tiles = _cdiv(M, tm)
    resident_kw = {"pipeline_mode": pl.Buffered(1)} if has_buffered else {}

    if tn == D:
        grid = (n_row_tiles,)
        in_specs = [
            pl.BlockSpec((tm, D), lambda i: (i, 0)),
            pl.BlockSpec((D, D), lambda i: (0, 0), **resident_kw),   # W resident
            pl.BlockSpec((1, D), lambda i: (0, 0), **resident_kw),   # b resident
        ]
        out_specs = pl.BlockSpec((tm, D), lambda i: (i, 0))
        kernel = functools.partial(_residual_linear_kernel_full,
                                   cast_bf16=cast_bf16)
        semantics = ("parallel",)
        io_aliases = {0: 0} if donate_x else {}
    else:
        grid = (n_row_tiles, D // tn)
        stripe_kw = ({"pipeline_mode": pl.Buffered(3)}
                     if (tn <= 256 and has_buffered) else {})
        in_specs = [
            pl.BlockSpec((tm, D), lambda i, j: (i, 0)),               # x resident over j
            pl.BlockSpec((D, tn), lambda i, j: (0, j), **stripe_kw),  # W stripe
            pl.BlockSpec((1, D), lambda i, j: (0, 0), **resident_kw), # b resident
        ]
        out_specs = pl.BlockSpec((tm, tn), lambda i, j: (i, j))
        kernel = functools.partial(_residual_linear_kernel_cols,
                                   tn=tn, cast_bf16=cast_bf16)
        semantics = ("parallel", "parallel")
        io_aliases = {}   # never alias on the column path (W re-reads x rows)

    y2 = pl.pallas_call(
        kernel,
        out_shape=jax.ShapeDtypeStruct((M, D), x.dtype),
        grid_spec=pltpu.PrefetchScalarGridSpec(
            num_scalar_prefetch=0,
            grid=grid,
            in_specs=in_specs,
            out_specs=out_specs,
        ),
        compiler_params=pltpu.CompilerParams(
            dimension_semantics=semantics,
            vmem_limit_bytes=vmem_limit,
        ),
        input_output_aliases=io_aliases,
    )(x2, w_pass, b2)

    return y2.reshape(orig_shape)


def residual_linear_ref(x, w, b):
    xf = x.astype(jnp.float32)
    h = jnp.maximum(xf @ w.astype(jnp.float32) + b.astype(jnp.float32)[None, :], 0.0)
    return (xf + h).astype(x.dtype)


# ---------------------------------------------------------------------------
# Self-test
# ---------------------------------------------------------------------------
if __name__ == "__main__":
    key = jax.random.PRNGKey(0)

    def make_params(k, d, dtype):
        kw, kb = jax.random.split(k)
        bound = 1.0 / (d ** 0.5)
        w = jax.random.uniform(kw, (d, d), jnp.float32, -bound, bound)
        b = jax.random.uniform(kb, (d,), jnp.float32, -bound, bound)
        return w.astype(dtype), b

    # 1) f32, small shapes implied by the module: Linear(d, d) on [B, S, d].
    d = 128
    k1, k2, k3, key = jax.random.split(key, 4)
    w, b = make_params(k1, d, jnp.float32)
    x = jax.random.normal(k2, (2, 8, d), jnp.float32)
    y = jax.block_until_ready(residual_linear(x, w, b))
    y_ref = residual_linear_ref(x.reshape(-1, d), w, b).reshape(x.shape)
    assert jnp.allclose(y, y_ref, atol=1e-4, rtol=1e-4), "f32 mismatch"

    # 2) ragged M (batch*seq not a multiple of the tile) -> partial-block path.
    x_r = jax.random.normal(k3, (2, 7, d), jnp.float32)
    y_r = jax.block_until_ready(residual_linear(x_r, w, b))
    y_r_ref = residual_linear_ref(x_r.reshape(-1, d), w, b).reshape(x_r.shape)
    assert jnp.allclose(y_r, y_r_ref, atol=1e-4, rtol=1e-4), "ragged-M mismatch"

    # 3) multi-row-tile with a partial last tile (M=300, tm=128): validates
    #    the no-pad / dropped-OOB-write path across several grid steps.
    k3b, key = jax.random.split(key)
    x_m = jax.random.normal(k3b, (300, d), jnp.float32)
    y_m = jax.block_until_ready(residual_linear(x_m, w, b, tm=128))
    y_m_ref = residual_linear_ref(x_m, w, b)
    assert jnp.allclose(y_m, y_m_ref, atol=1e-4, rtol=1e-4), "partial-tile mismatch"

    # 4) bf16 activations/weights with f32 accumulation inside the kernel.
    k4, k5, key = jax.random.split(key, 3)
    w16, b16 = make_params(k4, d, jnp.bfloat16)
    x16 = jax.random.normal(k5, (2, 8, d), jnp.bfloat16)
    y16 = jax.block_until_ready(residual_linear(x16, w16, b16))
    y16_ref = residual_linear_ref(x16.reshape(-1, d), w16, b16).reshape(x16.shape)
    assert jnp.allclose(y16.astype(jnp.float32), y16_ref.astype(jnp.float32),
                        atol=3e-2, rtol=3e-2), "bf16 mismatch"

    # 5) force the column-tiled (large-D) code path on a small problem.
    d2 = 256
    k6, k7, key = jax.random.split(key, 3)
    w2, b2 = make_params(k6, d2, jnp.float32)
    x2 = jax.random.normal(k7, (16, d2), jnp.float32)
    y2 = jax.block_until_ready(residual_linear(x2, w2, b2, tn=128))
    y2_ref = residual_linear_ref(x2, w2, b2)
    assert jnp.allclose(y2, y2_ref, atol=1e-4, rtol=1e-4), "column-tiled mismatch"

    # 6) opt-in bf16 MXU path for f32 inputs (looser tolerance).
    k8, _ = jax.random.split(key)
    x_mx = jax.random.normal(k8, (2, 8, d), jnp.float32)
    y_mx = jax.block_until_ready(residual_linear(x_mx, w, b, mxu_bf16=True))
    y_mx_ref = residual_linear_ref(x_mx.reshape(-1, d), w, b).reshape(x_mx.shape)
    assert jnp.allclose(y_mx, y_mx_ref, atol=5e-2, rtol=5e-2), "mxu_bf16 mismatch"

    print("KERNEL_OK")
</pallas_src>

<mosaic_0001>
module attributes {stable_mosaic.version = 11 : i64} {
  func.func @_residual_linear_kernel_full(%arg0: i32, %arg1: memref<16x128xf32, #tpu.memory_space<vmem>>, %arg2: memref<128x128xf32, #tpu.memory_space<vmem>>, %arg3: memref<1x128xf32, #tpu.memory_space<vmem>>, %arg4: memref<16x128xf32, #tpu.memory_space<vmem>>) attributes {dimension_semantics = [#tpu.dimension_semantics<parallel>], iteration_bounds = array<i64: 1>, scalar_prefetch = 0 : i64, scratch_operands = 0 : i64, tpu.core_type = #tpu.core_type<tc>, window_params = [{transform_indices = @transform_0, window_bounds = array<i64: 16, 128>}, {pipeline_mode = #tpu.pipeline_mode<synchronous>, transform_indices = @transform_1, window_bounds = array<i64: 128, 128>}, {pipeline_mode = #tpu.pipeline_mode<synchronous>, transform_indices = @transform_2, window_bounds = array<i64: 1, 128>}, {transform_indices = @transform_3, window_bounds = array<i64: 16, 128>}]} {
    %c0 = arith.constant 0 : index
    %c0_0 = arith.constant 0 : index
    %0 = vector.load %arg1[%c0, %c0_0] : memref<16x128xf32, #tpu.memory_space<vmem>>, vector<16x128xf32>
    %c0_1 = arith.constant 0 : index
    %c0_2 = arith.constant 0 : index
    %1 = vector.load %arg2[%c0_1, %c0_2] : memref<128x128xf32, #tpu.memory_space<vmem>>, vector<128x128xf32>
    %cst = arith.constant dense<0.000000e+00> : vector<16x128xf32>
    %2 = tpu.matmul %0, %1, %cst {dimension_numbers = #tpu.dot_dimension_numbers<[1], [0], [0], [1], [0, 0, 1, 1], [], []>} : vector<16x128xf32>, vector<128x128xf32>, vector<16x128xf32> -> vector<16x128xf32>
    %c0_3 = arith.constant 0 : index
    %c0_4 = arith.constant 0 : index
    %3 = vector.load %arg3[%c0_3, %c0_4] : memref<1x128xf32, #tpu.memory_space<vmem>>, vector<1x128xf32>
    %4 = vector.broadcast %3 : vector<1x128xf32> to vector<16x128xf32>
    %5 = arith.addf %2, %4 : vector<16x128xf32>
    %cst_5 = arith.constant 0.000000e+00 : f32
    %6 = vector.broadcast %cst_5 : f32 to vector<16x128xf32>
    %7 = arith.maximumf %5, %6 : vector<16x128xf32>
    %8 = arith.addf %0, %7 : vector<16x128xf32>
    %c0_6 = arith.constant 0 : index
    %c0_7 = arith.constant 0 : index
    %9 = vector.load %arg4[%c0_6, %c0_7] : memref<16x128xf32, #tpu.memory_space<vmem>>, vector<16x128xf32>
    tpu.vector_store %arg4[%c0_6, %c0_7], %8 {strides = array<i32>} : memref<16x128xf32, #tpu.memory_space<vmem>>, vector<16x128xf32>,
    return
  }
  func.func @transform_0(%arg0: i32) -> (i32, i32) {
    %c0_i32 = arith.constant 0 : i32
    %c0_i32_0 = arith.constant 0 : i32
    return %arg0, %c0_i32 : i32, i32
  }
  func.func @transform_1(%arg0: i32) -> (i32, i32) {
    %c0_i32 = arith.constant 0 : i32
    %c0_i32_0 = arith.constant 0 : i32
    %c0_i32_1 = arith.constant 0 : i32
    return %c0_i32, %c0_i32_0 : i32, i32
  }
  func.func @transform_2(%arg0: i32) -> (i32, i32) {
    %c0_i32 = arith.constant 0 : i32
    %c0_i32_0 = arith.constant 0 : i32
    %c0_i32_1 = arith.constant 0 : i32
    return %c0_i32, %c0_i32_0 : i32, i32
  }
  func.func @transform_3(%arg0: i32) -> (i32, i32) {
    %c0_i32 = arith.constant 0 : i32
    %c0_i32_0 = arith.constant 0 : i32
    return %arg0, %c0_i32 : i32, i32
  }
}

</mosaic_0001>

<bundles_post_ra>
// kernel: tpu_custom_call.1
= control target key start
LH: loop header
LB: loop body
LE: loop exit
PB: predicated region body
PF: predicated region fallthrough
CT: control target
= control target key end

     0   :  { %8 = vsyncpa [#allocation3], 0  ;;  %s264_s0 = inlined_call_operand.hbm [shape: f32[16,128], index: 0, kind: input, shape index: {}]   ;;  %s265_s1 = inlined_call_operand.hbm [shape: f32[128,128], index: 1, kind: input, shape index: {}]   ;;  %s266_s2 = inlined_call_operand.vmem [shape: f32[1,128], index: 2, kind: input, shape index: {}]   ;;  %s267_s3 = inlined_call_operand.hbm [shape: f32[16,128], index: 3, kind: output, shape index: {}]  }
   0x1   :  { %9 = vsyncpa [#allocation6], 0 }
   0x2   :  { %10 = vsyncpa [#allocation4], 0  ;;  %s15_s14 = sshll.u32 %s264_s0, 4  ;;  %s218_s15 = smov [#allocation2]   ;;  %s16_s14 = int_to_ptr.hbm [resolvable:$true] %s15_s14 }
   0x3   :  { %s17_s16 = sshll.u32 %s218_s15, 4  ;;  %s28_s19 = sshll.u32 %s265_s1, 4  ;;  %s18_s16 = int_to_ptr.vmem [resolvable:$true] %s17_s16  ;;  %s29_s19 = int_to_ptr.hbm [resolvable:$true] %s28_s19 }
   0x4   :  { %s219_s20 = smov 128   ;;  %s220_s21 = smov 8  }
   0x5   :  { %23 = dma.hbm_to_vmem [thread:$0]  %s16_s14, 256, %s18_s16, [#allocation3], %s219_s20, %s219_s20, %s220_s21  }
   0x6   :  { %s221_s22 = smov [#allocation5]  }
   0x7   :  { %s30_s23 = sshll.u32 %s221_s22, 4  ;;  %s31_s23 = int_to_ptr.vmem [resolvable:$true] %s30_s23 }
   0x8   :  { %36 = dma.hbm_to_vmem [thread:$0]  %s29_s19, 2048, %s31_s23, [#allocation6], %s219_s20, %s219_s20, %s220_s21  }
   0x9   :  { %212 = dma.done.wait [#allocation3], 256  }
   0xa   :  { %213 = vsyncadd [#allocation3], 4294967040 }
   0xb   :  { %214 = dma.done.wait [#allocation6], 2048  }
   0xc   :  { %215 = vsyncadd [#allocation6], 4294965248  ;;  %v64_v0 = vld [vmem:[#allocation5 + $0x78] sm:$0xff]  ;;  %v63_v1 = vld [vmem:[#allocation5 + $0x70] sm:$0xff]  ;;  %s222_s24 = smov [#allocation7]   ;;  %s104_s28 = sshll.u32 %s267_s3, 4  ;;  %s105_s28 = int_to_ptr.hbm [resolvable:$true] %s104_s28 }
   0xd   :  { %69 = vmatpush.msra.mxu0 %v64_v0  ;;  %118 = vmatpush.msra.mxu1 %v64_v0  ;;  %v62_v2 = vld [vmem:[#allocation5 + $0x68] sm:$0xff]  ;;  %v61_v3 = vld [vmem:[#allocation5 + $0x60] sm:$0xff]  ;;  %v60_v4 = vld [vmem:[#allocation5 + $0x58] sm:$0xff]  ;;  %s102_s25 = sshll.u32 %s222_s24, 4  ;;  %s103_s25 = int_to_ptr.vmem [resolvable:$true] %s102_s25 }
   0xe   :  { %v59_v5 = vld [vmem:[#allocation5 + $0x50] sm:$0xff]  ;;  %v58_v6 = vld [vmem:[#allocation5 + $0x48] sm:$0xff]  ;;  %v57_v7 = vld [vmem:[#allocation5 + $0x40] sm:$0xff] }
   0xf   :  { %70 = vmatpush.msra.mxu0 %v63_v1  ;;  %119 = vmatpush.msra.mxu1 %v63_v1  ;;  %v56_v8 = vld [vmem:[#allocation5 + $0x38] sm:$0xff]  ;;  %v55_v9 = vld [vmem:[#allocation5 + $0x30] sm:$0xff]  ;;  %v54_v10 = vld [vmem:[#allocation5 + $0x28] sm:$0xff] }
  0x10   :  { %v53_v11 = vld [vmem:[#allocation5 + $0x20] sm:$0xff]  ;;  %v52_v12 = vld [vmem:[#allocation5 + $0x18] sm:$0xff]  ;;  %v51_v13 = vld [vmem:[#allocation5 + $0x10] sm:$0xff] }
  0x11   :  { %71 = vmatpush.msra.mxu0 %v62_v2  ;;  %120 = vmatpush.msra.mxu1 %v62_v2  ;;  %v50_v14 = vld [vmem:[#allocation5 + $0x8] sm:$0xff]  ;;  %v49_v15 = vld [vmem:[#allocation5] sm:$0xff]  ;;  %v47_v16 = vld [vmem:[#allocation2] sm:$0xff] }
  0x12   :  { %v48_v17 = vld [vmem:[#allocation2 + $0x8] sm:$0xff]  ;;  %v139_v18 = vld [vmem:[%s266_s2] ss:$0 sm:$0xff] }
  0x13   :  { %72 = vmatpush.msra.mxu0 %v61_v3  ;;  %121 = vmatpush.msra.mxu1 %v61_v3 }
  0x15   :  { %73 = vmatpush.msra.mxu0 %v60_v4  ;;  %122 = vmatpush.msra.mxu1 %v60_v4 }
  0x17   :  { %74 = vmatpush.msra.mxu0 %v59_v5  ;;  %123 = vmatpush.msra.mxu1 %v59_v5 }
  0x19   :  { %75 = vmatpush.msra.mxu0 %v58_v6  ;;  %124 = vmatpush.msra.mxu1 %v58_v6 }
  0x1b   :  { %76 = vmatpush.msra.mxu0 %v57_v7  ;;  %125 = vmatpush.msra.mxu1 %v57_v7 }
  0x1d   :  { %77 = vmatpush.msra.mxu0 %v56_v8  ;;  %126 = vmatpush.msra.mxu1 %v56_v8 }
  0x1f   :  { %78 = vmatpush.msra.mxu0 %v55_v9  ;;  %127 = vmatpush.msra.mxu1 %v55_v9 }
  0x21   :  { %79 = vmatpush.msra.mxu0 %v54_v10  ;;  %128 = vmatpush.msra.mxu1 %v54_v10 }
  0x23   :  { %80 = vmatpush.msra.mxu0 %v53_v11  ;;  %129 = vmatpush.msra.mxu1 %v53_v11 }
  0x25   :  { %81 = vmatpush.msra.mxu0 %v52_v12  ;;  %130 = vmatpush.msra.mxu1 %v52_v12 }
  0x27   :  { %82 = vmatpush.msra.mxu0 %v51_v13  ;;  %131 = vmatpush.msra.mxu1 %v51_v13 }
  0x29   :  { %83 = vmatpush.msra.mxu0 %v50_v14  ;;  %132 = vmatpush.msra.mxu1 %v50_v14 }
  0x2b   :  { %84 = vmatpush.msra.mxu0 %v49_v15  ;;  %133 = vmatpush.msra.mxu1 %v49_v15 }
  0x2c   :  { %85 = vmatmul.f32.vlgmr.msra.gmra.mxu0 %v47_v16  ;;  %88 = vmatmul.f32.vlgmr.msra.gmra.mxu1 %v48_v17 }
  0xa9   :  { %v86_v19 = vpop.f32.mrf.mxu0  ;;  %v89_v20 = vpop.f32.mrf.mxu1 }
  0xaa   :  { %v87_v21 = vadd.f32 %v139_v18, %v86_v19  ;;  %v90_v22 = vadd.f32 %v139_v18, %v89_v20 }
  0xac   :  { %v92_v23 = vmax.f32 %v87_v21, 0.0  ;;  %v93_v24 = vmax.f32 %v90_v22, 0.0 }
  0xae   :  { %v94_v25 = vadd.f32 %v92_v23, %v47_v16  ;;  %v95_v26 = vadd.f32 %v93_v24, %v48_v17 }
  0xb0   :  { %96 = vst [vmem:[#allocation7] sm:$0xff] %v94_v25 }
  0xb1   :  { %97 = vst [vmem:[#allocation7 + $0x8] sm:$0xff] %v95_v26 }
  0xb2   :  { %110 = dma.vmem_to_hbm [thread:$0]  %s103_s25, 256, %s105_s28, [#allocation4], %s219_s20, %s219_s20, %s220_s21  }
  0xb3   :  { %216 = dma.done.wait [#allocation4], 256  }
  0xb4   :  { %217 = vsyncadd [#allocation4], 4294967040 }
  0xb5   :  { %115 = vsyncpa [#allocation3], 1 }
  0xb6   :  { %116 = vsyncpa [#allocation6], 1 }
  0xb7   :  { %117 = vsyncpa [#allocation4], 1 }

</bundles_post_ra>
